<compile_context>
chip_gen: v7x
topology: tpu7x:2x2x1
jax: 0.10.0
libtpu: 0.0.40
codegen_flags: <defaults>
</compile_context>

<pallas_src>
import jax
import jax.numpy as jnp
from jax.experimental import pallas as pl
from jax.experimental.pallas import tpu as pltpu


TARGET_TILE_BYTES = 8 << 20   # ~8 MiB per I/O tile
VMEM_LIMIT_BYTES = 48 << 20   # ~32 MiB live (in+out double-buffered) + headroom; < v7x 64 MiB


def _poly_kernel(coef_ref, x_ref, o_ref):
    # coef_ref: SMEM (3,) float32 -> a, b, c scalars.
    a = coef_ref[0]
    b = coef_ref[1]
    c = coef_ref[2]
    # Keep HBM I/O in the caller's dtype; upcast in-register for the arithmetic.
    x = x_ref[...].astype(jnp.float32)
    # Horner form: (a*x + b)*x + c  -> 2 mul + 2 add per element.
    o_ref[...] = ((a * x + b) * x + c).astype(o_ref.dtype)


def _round_up(n, m):
    return ((n + m - 1) // m) * m


def poly_unit_forward(x, a, b, c, *, donate_input=False):
    """Elementwise a*x**2 + b*x + c, matching PyTorch PolyUnit.forward (any shape)."""
    orig_shape = x.shape
    total = int(x.size)

    # Preserve floating I/O dtype (f32/bf16); anything else is promoted to f32.
    if x.dtype == jnp.float32 or x.dtype == jnp.bfloat16:
        io_dtype = x.dtype
    else:
        io_dtype = jnp.float32

    if total == 0:  # degenerate empty input
        return jnp.zeros(orig_shape, dtype=io_dtype)

    itemsize = jnp.dtype(io_dtype).itemsize
    row_align = 32 // itemsize  # 8 rows (f32) / 16 rows (bf16): native sublane tile

    # Lane-dense last dim: prefer wider lanes when they divide the element count
    # exactly (zero padding); otherwise 128 lanes + minimal (<128 elem) tail pad.
    lanes = 128
    for cand in (512, 256, 128):
        if total % cand == 0:
            lanes = cand
            break
    padded_total = _round_up(total, lanes)
    rows = padded_total // lanes

    x_flat = x.reshape(-1)
    if x_flat.dtype != io_dtype:
        x_flat = x_flat.astype(io_dtype)
    if padded_total != total:
        x_flat = jnp.pad(x_flat, (0, padded_total - total))
    x2d = x_flat.reshape(rows, lanes)

    coef = jnp.stack([
        jnp.asarray(a, dtype=jnp.float32).reshape(()),
        jnp.asarray(b, dtype=jnp.float32).reshape(()),
        jnp.asarray(c, dtype=jnp.float32).reshape(()),
    ])

    # Tile sizing: ~8 MiB tiles amortize the fixed per-grid-step overhead to a few
    # percent even at v7x HBM bandwidth; keep block_rows a multiple of the native
    # sublane tile and split into an even number of near-equal blocks (>=2) so
    # v7x's two TensorCores share the "parallel" axis.
    max_block_rows = max(row_align,
                         (TARGET_TILE_BYTES // (lanes * itemsize)) // row_align * row_align)
    if rows <= row_align:
        block_rows = rows                      # single tiny full-extent block
    else:
        n_splits = 2
        while _round_up(pl.cdiv(rows, n_splits), row_align) > max_block_rows:
            n_splits += 2
        block_rows = _round_up(pl.cdiv(rows, n_splits), row_align)

    grid = (pl.cdiv(rows, block_rows),)        # partial last block masked by Pallas
    tile = (block_rows, lanes)

    out2d = pl.pallas_call(
        _poly_kernel,
        out_shape=jax.ShapeDtypeStruct((rows, lanes), io_dtype),
        grid=grid,
        in_specs=[
            pl.BlockSpec(memory_space=pltpu.SMEM),      # (3,) coefficients
            pl.BlockSpec(tile, lambda i: (i, 0)),
        ],
        out_specs=pl.BlockSpec(tile, lambda i: (i, 0)),
        input_output_aliases=({1: 0} if donate_input else {}),
        compiler_params=pltpu.CompilerParams(
            dimension_semantics=("parallel",),
            vmem_limit_bytes=VMEM_LIMIT_BYTES,
        ),
    )(coef, x2d)

    out_flat = out2d.reshape(-1)
    if padded_total != total:
        out_flat = out_flat[:total]
    return out_flat.reshape(orig_shape)


# TODO(synk): the module's custom backward()/manual parameter update (training step)
# is not part of the forward pass and is not implemented here.


if __name__ == "__main__":
    key = jax.random.PRNGKey(0)
    kx, ka, kb, kc = jax.random.split(key, 4)

    # Deterministic scalar params, like nn.Parameter(torch.randn(1))
    a = jax.random.normal(ka, (1,), dtype=jnp.float32)[0]
    b = jax.random.normal(kb, (1,), dtype=jnp.float32)[0]
    c = jax.random.normal(kc, (1,), dtype=jnp.float32)[0]

    # Small NCHW input: batch=2, channels=4, spatial=16x16
    x = jax.random.normal(kx, (2, 4, 16, 16), dtype=jnp.float32)
    y = jax.block_until_ready(poly_unit_forward(x, a, b, c))
    y_ref = a * x ** 2 + b * x + c
    assert y.shape == x.shape and y.dtype == x.dtype
    assert jnp.allclose(y, y_ref, atol=1e-5, rtol=1e-5)

    # Odd-sized shape: exercises the minimal (<128 elem) lane pad + partial last block.
    x_odd = jax.random.normal(kx, (3, 5, 7, 11), dtype=jnp.float32)
    y_odd = jax.block_until_ready(poly_unit_forward(x_odd, a, b, c))
    assert jnp.allclose(y_odd, a * x_odd ** 2 + b * x_odd + c, atol=1e-5, rtol=1e-5)

    # Dtype-preserving path: bf16 in -> bf16 out (compute still in f32 in-register).
    x_bf = x.astype(jnp.bfloat16)
    y_bf = jax.block_until_ready(poly_unit_forward(x_bf, a, b, c))
    assert y_bf.dtype == jnp.bfloat16
    xb32 = x_bf.astype(jnp.float32)
    ref_bf = a * xb32 ** 2 + b * xb32 + c
    assert jnp.allclose(y_bf.astype(jnp.float32), ref_bf, atol=5e-2, rtol=5e-2)

    # Degenerate empty input.
    y_empty = poly_unit_forward(jnp.zeros((0, 4), jnp.float32), a, b, c)
    assert y_empty.shape == (0, 4)

    print("KERNEL_OK")
</pallas_src>

<mosaic_0001>
module attributes {stable_mosaic.version = 11 : i64} {
  func.func @_poly_kernel(%arg0: i32, %arg1: memref<3xf32, #tpu.memory_space<smem>>, %arg2: memref<4x512xf32, #tpu.memory_space<vmem>>, %arg3: memref<4x512xf32, #tpu.memory_space<vmem>>) attributes {dimension_semantics = [#tpu.dimension_semantics<parallel>], iteration_bounds = array<i64: 1>, scalar_prefetch = 0 : i64, scratch_operands = 0 : i64, tpu.core_type = #tpu.core_type<tc>, window_params = [{transform_indices = @transform_0, window_bounds = array<i64: 3>}, {transform_indices = @transform_1, window_bounds = array<i64: 4, 512>}, {transform_indices = @transform_2, window_bounds = array<i64: 4, 512>}]} {
    %c0 = arith.constant 0 : index
    %0 = memref.load %arg1[%c0] : memref<3xf32, #tpu.memory_space<smem>>
    %c1 = arith.constant 1 : index
    %1 = memref.load %arg1[%c1] : memref<3xf32, #tpu.memory_space<smem>>
    %c2 = arith.constant 2 : index
    %2 = memref.load %arg1[%c2] : memref<3xf32, #tpu.memory_space<smem>>
    %c0_0 = arith.constant 0 : index
    %c0_1 = arith.constant 0 : index
    %3 = vector.load %arg2[%c0_0, %c0_1] : memref<4x512xf32, #tpu.memory_space<vmem>>, vector<4x512xf32>
    %4 = vector.broadcast %0 : f32 to vector<4x512xf32>
    %5 = arith.mulf %4, %3 : vector<4x512xf32>
    %6 = vector.broadcast %1 : f32 to vector<4x512xf32>
    %7 = arith.addf %5, %6 : vector<4x512xf32>
    %8 = arith.mulf %7, %3 : vector<4x512xf32>
    %9 = vector.broadcast %2 : f32 to vector<4x512xf32>
    %10 = arith.addf %8, %9 : vector<4x512xf32>
    %c0_2 = arith.constant 0 : index
    %c0_3 = arith.constant 0 : index
    %11 = vector.load %arg3[%c0_2, %c0_3] : memref<4x512xf32, #tpu.memory_space<vmem>>, vector<4x512xf32>
    tpu.vector_store %arg3[%c0_2, %c0_3], %10 {strides = array<i32>} : memref<4x512xf32, #tpu.memory_space<vmem>>, vector<4x512xf32>,
    return
  }
  func.func @transform_0(%arg0: i32) -> i32 {
    %c0_i32 = arith.constant 0 : i32
    %c0_i32_0 = arith.constant 0 : i32
    return %c0_i32 : i32
  }
  func.func @transform_1(%arg0: i32) -> (i32, i32) {
    %c0_i32 = arith.constant 0 : i32
    %c0_i32_0 = arith.constant 0 : i32
    return %arg0, %c0_i32 : i32, i32
  }
  func.func @transform_2(%arg0: i32) -> (i32, i32) {
    %c0_i32 = arith.constant 0 : i32
    %c0_i32_0 = arith.constant 0 : i32
    return %arg0, %c0_i32 : i32, i32
  }
}

</mosaic_0001>

<bundles_post_ra>
// kernel: tpu_custom_call.1
= control target key start
LH: loop header
LB: loop body
LE: loop exit
PB: predicated region body
PF: predicated region fallthrough
CT: control target
= control target key end

     0   :  { %7 = vsyncpa [#allocation5], 0  ;;  %s188_s0 = inlined_call_operand.hbm [shape: f32[3], index: 0, kind: input, shape index: {}]   ;;  %s189_s1 = inlined_call_operand.hbm [shape: f32[4,512], index: 1, kind: input, shape index: {}]   ;;  %s190_s2 = inlined_call_operand.hbm [shape: f32[4,512], index: 2, kind: output, shape index: {}]  }
   0x1   :  { %8 = vsyncpa [#allocation3], 0 }
   0x2   :  { %9 = vsyncpa [#allocation4], 0  ;;  %s74_s11 = scalar_lea.hbm %s188_s0, 16 }
   0x3   :  { %p75_p0 = scmp.ne.s32.totalorder %s188_s0, %s74_s11  ;;  %p78_p1 = scmp.lt.u32.totalorder %s74_s11, %s188_s0 }
   0x5   :  { %p80_p2 = pnand %p78_p1, %p75_p0 }
   0x7   :  { %83 = shalt.err (!%p80_p2)
}
   0x8   :  { %s134_s16 = smov [#allocation2]   ;;  %s135_s19 = smov [#allocation6]  }
   0x9   :  { %17 = dma.hbm_to_smem %s188_s0, 16, %s134_s16, [#allocation5]  }
   0xa   :  { %s24_s20 = sshll.u32 %s135_s19, 4  ;;  %s84_s23 = scalar_lea.hbm %s189_s1, 256  ;;  %s25_s20 = int_to_ptr.vmem [resolvable:$true] %s24_s20 }
   0xb   :  { %p85_p3 = scmp.ne.s32.totalorder %s189_s1, %s84_s23  ;;  %p88_p4 = scmp.lt.u32.totalorder %s84_s23, %s189_s1 }
   0xd   :  { %p90_p5 = pnand %p88_p4, %p85_p3 }
   0xf   :  { %93 = shalt.err (!%p90_p5)
}
  0x10   :  { %s94_s28 = scalar_lea.vmem %s25_s20, 256  ;;  %p99_p7 = scmp.lt.s32.totalorder %s25_s20, %s25_s20 }
  0x11   :  { %p95_p6 = scmp.ne.s32.totalorder %s25_s20, %s94_s28  ;;  %p100_p8 = scmp.lt.s32.totalorder %s94_s28, %s94_s28 }
  0x13   :  { %p101_p9 = por %p100_p8, %p99_p7 }
  0x15   :  { %p102_p10 = pnand %p101_p9, %p95_p6 }
  0x17   :  { %105 = shalt.err (!%p102_p10)
}
  0x18   :  { %27 = dma.hbm_to_vmem [thread:$0]  %s189_s1, 256, %s25_s20, [#allocation3]  }
  0x19   :  { %128 = dma.done.wait [#allocation5], 16  }
  0x1a   :  { %129 = vsyncadd [#allocation5], 4294967280 }
  0x1b   :  { %130 = dma.done.wait [#allocation3], 256  }
  0x1c   :  { %131 = vsyncadd [#allocation3], 4294967040 }
  0x1d   :  { %34 = sfence }
  0x1e   :  { %s35_s30 = sld [smem:[#allocation2]]  ;;  %s69_s3 = sld [smem:[#allocation2 + $0x1]]  ;;  %v38_v0 = vld [vmem:[#allocation6] sm:$0xff]  ;;  %v39_v1 = vld [vmem:[#allocation6 + $0x8] sm:$0xff] }
  0x1f   :  { %s70_s4 = sld [smem:[#allocation2 + $0x2]]  ;;  %s136_s5 = smov [#allocation7]  }
  0x20   :  { %s59_s6 = sshll.u32 %s136_s5, 4  ;;  %s60_s6 = int_to_ptr.vmem [resolvable:$true] %s59_s6 }
  0x21   :  { %s106_s1 = scalar_lea.vmem %s60_s6, 256  ;;  %p111_p12 = scmp.lt.s32.totalorder %s60_s6, %s60_s6 }
  0x22   :  { %p107_p11 = scmp.ne.s32.totalorder %s60_s6, %s106_s1  ;;  %p112_p13 = scmp.lt.s32.totalorder %s106_s1, %s106_s1 }
  0x24   :  { %v40_v2 = vstv %s35_s30  ;;  %v43_v3 = vstv %s69_s3  ;;  %p113_p0 = por %p112_p13, %p111_p12 }
  0x25   :  { %v41_v4 = vmul.f32 %v40_v2, %v38_v0  ;;  %v42_v5 = vmul.f32 %v40_v2, %v39_v1  ;;  %v48_v8 = vstv %s70_s4 }
  0x26   :  { %p114_p1 = pnand %p113_p0, %p107_p11 }
  0x27   :  { %v44_v6 = vadd.f32 %v43_v3, %v41_v4  ;;  %v45_v7 = vadd.f32 %v43_v3, %v42_v5 }
  0x29   :  { %v46_v9 = vmul.f32 %v44_v6, %v38_v0  ;;  %v47_v10 = vmul.f32 %v45_v7, %v39_v1 }
  0x2b   :  { %v49_v11 = vadd.f32 %v48_v8, %v46_v9  ;;  %v50_v12 = vadd.f32 %v48_v8, %v47_v10 }
  0x2d   :  { %51 = vst [vmem:[#allocation7] sm:$0xff] %v49_v11  ;;  %52 = vst [vmem:[#allocation7 + $0x8] sm:$0xff] %v50_v12 }
  0x2e   :  { %117 = shalt.err (!%p114_p1)
}
  0x2f   :  { %s118_s9 = scalar_lea.hbm %s190_s2, 256 }
  0x30   :  { %p119_p2 = scmp.ne.s32.totalorder %s190_s2, %s118_s9  ;;  %p122_p3 = scmp.lt.u32.totalorder %s118_s9, %s190_s2 }
  0x32   :  { %p124_p4 = pnand %p122_p3, %p119_p2 }
  0x34   :  { %127 = shalt.err (!%p124_p4)
}
  0x35   :  { %62 = dma.vmem_to_hbm [thread:$0]  %s60_s6, 256, %s190_s2, [#allocation4]  }
  0x36   :  { %132 = dma.done.wait [#allocation4], 256  }
  0x37   :  { %133 = vsyncadd [#allocation4], 4294967040 }
  0x38   :  { %66 = vsyncpa [#allocation3], 1 }
  0x39   :  { %67 = vsyncpa [#allocation4], 1 }
  0x3a   :  { %68 = vsyncpa [#allocation5], 1 }

</bundles_post_ra>
